<compile_context>
chip_gen: v6e
topology: v6e:2x2x1
jax: 0.10.0
libtpu: 0.0.40
codegen_flags: <defaults>
</compile_context>

<pallas_src>
import math
import functools

import jax
import jax.numpy as jnp
from jax.experimental import pallas as pl
from jax.experimental.pallas import tpu as pltpu


# ----------------------------------------------------------------------------- helpers
def _layernorm(v, eps=1e-5):
    mu = jnp.mean(v, axis=-1, keepdims=True)
    var = jnp.mean(jnp.square(v - mu), axis=-1, keepdims=True)
    return (v - mu) * jax.lax.rsqrt(var + eps)


def _scale_shift(v, scale, shift=None):
    # apply_scale_shift: x * (scale + 1) (+ shift), then a non-affine LayerNorm.
    v = v * (scale + 1.0)
    if shift is not None:
        v = v + shift
    return _layernorm(v)


def _gelu_tanh(v):
    # TODO(synk): torch nn.GELU() defaults to exact erf; the tanh approximation
    # deviates by <~4e-4 pointwise but needs only one EUP op instead of an erf
    # polynomial on the widest (TQ, 4E) tensor in the block.
    c = math.sqrt(2.0 / math.pi)
    return 0.5 * v * (1.0 + jnp.tanh(c * (v + 0.044715 * v * v * v)))


# ----------------------------------------------------------------------------- kernel 1
def _qkv_kernel(x_ref, ss_ref, ln1w_ref, ln1b_ref, wqkv_ref, bqkv_ref, o_ref,
                *, matmul_dtype):
    x = x_ref[0].astype(jnp.float32)              # (TL, E)
    ss = ss_ref[0].astype(jnp.float32)            # (6, E): a1, b1, g1, a2, b2, g2
    beta1 = ss[1:2, :]
    gamma1 = ss[2:3, :]

    h = _layernorm(x) * ln1w_ref[...] + ln1b_ref[...]        # nn.LayerNorm (affine)
    h = _scale_shift(h, gamma1, beta1)

    qkv = jnp.dot(h.astype(matmul_dtype), wqkv_ref[...],
                  preferred_element_type=jnp.float32) + bqkv_ref[...]
    o_ref[0] = qkv.astype(o_ref.dtype)


# ----------------------------------------------------------------------------- kernel 2
def _attn_mlp_kernel(lens_ref,
                     x_ref, q_ref, k_ref, v_ref, sin_ref, cos_ref, ss_ref,
                     ln2w_ref, ln2b_ref, wo_ref, bo_ref, ffw1_ref, ffw2_ref,
                     o_ref, ctx_ref,
                     *, num_heads, head_dim, q_tile, matmul_dtype):
    b = pl.program_id(0)
    qi = pl.program_id(1)
    length = lens_ref[b]                          # number of valid (non-PAD) keys

    half = head_dim // 2
    dt = matmul_dtype
    L = k_ref.shape[2]

    x = x_ref[0].astype(jnp.float32)              # (TQ, E) residual input
    q = q_ref[0]                                  # (H, TQ, Dh)
    k = k_ref[0]                                  # (H, L, Dh)
    v = v_ref[0]                                  # (H, L, Dh)
    ss = ss_ref[0].astype(jnp.float32)            # (6, E)
    alpha1 = ss[0:1, :]
    alpha2 = ss[3:4, :]
    beta2 = ss[4:5, :]
    gamma2 = ss[5:6, :]

    # --- rotate-half RoPE, head-batched; split into the two half-dim lanes so no
    #     lane concat / rotate / per-head perm matmul is needed:
    #     rope(t) = [t1*cos - t2*sin, t2*cos + t1*sin]
    qs = pl.multiple_of(qi * q_tile, q_tile)
    sin_q = sin_ref[pl.ds(qs, q_tile), :]         # (TQ, half)
    cos_q = cos_ref[pl.ds(qs, q_tile), :]
    sin_k = sin_ref[...]                          # (L, half)
    cos_k = cos_ref[...]

    def rope_halves(t, s, c):
        t1 = t[..., :half].astype(jnp.float32)
        t2 = t[..., half:].astype(jnp.float32)
        return t1 * c - t2 * s, t2 * c + t1 * s

    qa, qb = rope_halves(q, sin_q, cos_q)         # (H, TQ, half) each
    ka, kb = rope_halves(k, sin_k, cos_k)         # (H, L, half) each

    # --- scores, all heads in one batched dot_general each; f32 MXU accumulation.
    s = jnp.einsum('hqd,hkd->hqk', qa.astype(dt), ka.astype(dt),
                   preferred_element_type=jnp.float32)
    s += jnp.einsum('hqd,hkd->hqk', qb.astype(dt), kb.astype(dt),
                    preferred_element_type=jnp.float32)
    s *= 1.0 / math.sqrt(head_dim)

    # --- key-padding bias built in-kernel (no dense (L, L) mask DMA).
    col = jax.lax.broadcasted_iota(jnp.int32, (1, 1, L), 2)
    s += jnp.where(col < length, 0.0, -1e30)

    # --- softmax in f32; normalization deferred until after the PV matmul so the
    #     reciprocal-multiply touches (H,TQ,Dh) instead of (H,TQ,L).
    s -= jnp.max(s, axis=-1, keepdims=True)
    p = jnp.exp(s)
    denom = jnp.sum(p, axis=-1, keepdims=True)    # (H, TQ, 1)

    ctx = jnp.einsum('hqk,hkd->hqd', p.astype(dt), v.astype(dt),
                     preferred_element_type=jnp.float32)
    # Exact reciprocal keeps the f32 path bit-tight against the pure-JAX
    # reference; approx=True would be one EUP op cheaper.
    ctx = ctx * pl.reciprocal(denom)

    # --- flatten heads into one (TQ, qkv) scratch -> ONE fused output projection.
    for hh in range(num_heads):
        ctx_ref[:, hh * head_dim:(hh + 1) * head_dim] = ctx[hh].astype(ctx_ref.dtype)
    attn = jnp.dot(ctx_ref[...], wo_ref[...],
                   preferred_element_type=jnp.float32) + bo_ref[...]

    h = _scale_shift(attn, alpha1)
    x1 = h + x

    # --- MLP block (Linear -> GELU -> Linear, both bias-free).
    h = _layernorm(x1) * ln2w_ref[...] + ln2b_ref[...]
    h = _scale_shift(h, gamma2, beta2)
    ff = jnp.dot(h.astype(dt), ffw1_ref[...], preferred_element_type=jnp.float32)
    ff = _gelu_tanh(ff)
    ff = jnp.dot(ff.astype(dt), ffw2_ref[...], preferred_element_type=jnp.float32)
    h = _scale_shift(ff, alpha2)

    o_ref[0] = (h + x1).astype(o_ref.dtype)


# ----------------------------------------------------------------------------- wrapper
def _full_spec(arr):
    nd = arr.ndim
    return pl.BlockSpec(arr.shape, lambda *args, _nd=nd: (0,) * _nd)


def _pick_tile(L, requested=None):
    if requested is not None:
        assert L % requested == 0 and (requested % 8 == 0 or requested == L)
        return requested
    for t in (256, 128, 64, 32, 16, 8):
        if L % t == 0:
            return t
    return L


def dit_block(x, cond, lengths, sin_h, cos_h, params, *,
              num_heads, seq_tile=None, q_tile=None, matmul_dtype=jnp.float32):
    """DiTBlock forward.

    x        : (B, L, E) tokens
    cond     : (B, cond_dim) timestep conditioning
    lengths  : (B,) int32 valid (non-PAD) tokens per row (key-padding mask)
    sin_h/cos_h : (L, head_dim // 2) rotary tables
    """
    B, L, E = x.shape
    qkv_dim = params['wq'].shape[1]
    head_dim = qkv_dim // num_heads
    assert head_dim * num_heads == qkv_dim and head_dim % 2 == 0

    TL = _pick_tile(L, seq_tile)
    TQ = _pick_tile(L, q_tile)
    dt = matmul_dtype
    f32 = jnp.float32

    # ---- MakeScaleShift hoisted out of the kernel (one matmul for every row) ----
    ss = (cond.astype(f32) @ params['mss_w'].astype(f32)
          + params['mss_b'].astype(f32)).reshape(B, 6, E)

    # ---- one-time weight preprocessing (fused QKV, matmul-dtype casts) ----
    wqkv = jnp.concatenate([params['wq'], params['wk'], params['wv']], axis=1).astype(dt)
    bqkv = jnp.concatenate([params['bq'], params['bk'], params['bv']], axis=1).astype(f32)
    wo = params['wo'].astype(dt)
    bo = params['bo'].astype(f32)
    ffw1 = params['ff_w1'].astype(dt)
    ffw2 = params['ff_w2'].astype(dt)
    ln1w = params['ln1_w'].astype(f32)
    ln1b = params['ln1_b'].astype(f32)
    ln2w = params['ln2_w'].astype(f32)
    ln2b = params['ln2_b'].astype(f32)
    sin_h = sin_h.astype(f32)
    cos_h = cos_h.astype(f32)
    lengths = lengths.astype(jnp.int32)

    # ---- kernel 1: LN1 + modulation + fused QKV projection, tiled over L ----
    qkv = pl.pallas_call(
        functools.partial(_qkv_kernel, matmul_dtype=dt),
        out_shape=jax.ShapeDtypeStruct((B, L, 3 * qkv_dim), dt),
        grid_spec=pltpu.PrefetchScalarGridSpec(
            num_scalar_prefetch=0,
            grid=(B, L // TL),
            in_specs=[
                pl.BlockSpec((1, TL, E), lambda b, l: (b, l, 0)),
                pl.BlockSpec((1, 6, E), lambda b, l: (b, 0, 0)),
                _full_spec(ln1w), _full_spec(ln1b),
                _full_spec(wqkv), _full_spec(bqkv),
            ],
            out_specs=pl.BlockSpec((1, TL, 3 * qkv_dim), lambda b, l: (b, l, 0)),
        ),
        compiler_params=pltpu.CompilerParams(
            dimension_semantics=("parallel", "parallel"),
            vmem_limit_bytes=48 * 1024 * 1024),
    )(x, ss, ln1w, ln1b, wqkv, bqkv)

    # ---- layout plumbing in XLA: (B, L, 3*qkv) -> three (B, H, L, Dh) tensors ----
    q, k, v = jnp.split(qkv, 3, axis=-1)

    def to_heads(t):
        return t.reshape(B, L, num_heads, head_dim).transpose(0, 2, 1, 3)

    qh, kh, vh = to_heads(q), to_heads(k), to_heads(v)

    # ---- kernel 2: attention + output projection + MLP, tiled over query tiles ----
    kernel = functools.partial(_attn_mlp_kernel, num_heads=num_heads,
                               head_dim=head_dim, q_tile=TQ, matmul_dtype=dt)
    # TODO(synk): constant-index weight blocks are still double-buffered; for very
    # large E consider pipeline_mode=pl.Buffered(1) on the weight specs.
    out = pl.pallas_call(
        kernel,
        out_shape=jax.ShapeDtypeStruct((B, L, E), x.dtype),
        grid_spec=pltpu.PrefetchScalarGridSpec(
            num_scalar_prefetch=1,                      # `lengths` lands in SMEM
            grid=(B, L // TQ),
            in_specs=[
                pl.BlockSpec((1, TQ, E), lambda b, qi, lens: (b, qi, 0)),                        # x
                pl.BlockSpec((1, num_heads, TQ, head_dim), lambda b, qi, lens: (b, 0, qi, 0)),   # q
                pl.BlockSpec((1, num_heads, L, head_dim), lambda b, qi, lens: (b, 0, 0, 0)),     # k
                pl.BlockSpec((1, num_heads, L, head_dim), lambda b, qi, lens: (b, 0, 0, 0)),     # v
                _full_spec(sin_h), _full_spec(cos_h),
                pl.BlockSpec((1, 6, E), lambda b, qi, lens: (b, 0, 0)),                          # ss
                _full_spec(ln2w), _full_spec(ln2b),
                _full_spec(wo), _full_spec(bo),
                _full_spec(ffw1), _full_spec(ffw2),
            ],
            out_specs=pl.BlockSpec((1, TQ, E), lambda b, qi, lens: (b, qi, 0)),
            scratch_shapes=[pltpu.VMEM((TQ, qkv_dim), dt)],
        ),
        compiler_params=pltpu.CompilerParams(
            dimension_semantics=("parallel", "parallel"),
            vmem_limit_bytes=48 * 1024 * 1024),
    )(lengths, x, qh, kh, vh, sin_h, cos_h, ss, ln2w, ln2b, wo, bo, ffw1, ffw2)

    return out


# ----------------------------------------------------------------------------- reference
def ref_forward(x, cond, lengths, sin_h, cos_h, p, *, num_heads, head_dim, gelu="erf"):
    """Pure-JAX reference mirroring the PyTorch forward (f32)."""
    B, L, E = x.shape

    def ln(v):
        mu = v.mean(-1, keepdims=True)
        var = ((v - mu) ** 2).mean(-1, keepdims=True)
        return (v - mu) / jnp.sqrt(var + 1e-5)

    def scale_shift(v, scale, shift=None):
        v = v * (scale + 1.0)[:, None, :]
        if shift is not None:
            v = v + shift[:, None, :]
        return ln(v)

    ss = cond @ p['mss_w'] + p['mss_b']
    a1, b1, g1, a2, b2, g2 = [ss[:, i * E:(i + 1) * E] for i in range(6)]

    res = x
    h = ln(x) * p['ln1_w'] + p['ln1_b']
    h = scale_shift(h, g1, b1)
    q = h @ p['wq'] + p['bq']
    k = h @ p['wk'] + p['bk']
    v = h @ p['wv'] + p['bv']

    sin = jnp.concatenate([sin_h, sin_h], axis=-1)
    cos = jnp.concatenate([cos_h, cos_h], axis=-1)
    half = head_dim // 2

    def rope(t):
        rot = jnp.concatenate([-t[..., half:], t[..., :half]], axis=-1)
        return t * cos + rot * sin

    key_valid = jnp.arange(L)[None, :] < lengths[:, None]          # (B, L)
    attn = jnp.zeros_like(x) + p['bo']
    for hh in range(num_heads):
        sl = slice(hh * head_dim, (hh + 1) * head_dim)
        qh, kh, vh = rope(q[..., sl]), rope(k[..., sl]), v[..., sl]
        s = jnp.einsum('bld,bmd->blm', qh, kh) / math.sqrt(head_dim)
        s = jnp.where(key_valid[:, None, :], s, -1e30)
        pr = jax.nn.softmax(s, axis=-1)
        attn = attn + jnp.einsum('blm,bmd->bld', pr, vh) @ p['wo'][sl, :]
    h = scale_shift(attn, a1)
    x1 = h + res

    res = x1
    h = ln(x1) * p['ln2_w'] + p['ln2_b']
    h = scale_shift(h, g2, b2)
    ff = h @ p['ff_w1']
    if gelu == "erf":
        ff = 0.5 * ff * (1.0 + jax.lax.erf(ff / math.sqrt(2.0)))    # torch default
    else:
        c = math.sqrt(2.0 / math.pi)
        ff = 0.5 * ff * (1.0 + jnp.tanh(c * (ff + 0.044715 * ff ** 3)))
    ff = ff @ p['ff_w2']
    h = scale_shift(ff, a2)
    return h + res


# ----------------------------------------------------------------------------- demo
if __name__ == "__main__":
    B, L, E = 2, 16, 32
    num_heads = 4
    qkv_dim = 32
    head_dim = qkv_dim // num_heads
    cond_dim = 16

    key = jax.random.PRNGKey(0)
    ks = jax.random.split(key, 20)
    init = lambda k, shape, s: jax.random.normal(k, shape, jnp.float32) * s

    # NOTE: the PyTorch module zero-inits MakeScaleShift and the last FF weight;
    # random values are used here so every code path is exercised numerically.
    params = dict(
        mss_w=init(ks[0], (cond_dim, 6 * E), 0.1),
        mss_b=init(ks[1], (1, 6 * E), 0.1),
        ln1_w=1.0 + init(ks[2], (1, E), 0.05),
        ln1_b=init(ks[3], (1, E), 0.05),
        ln2_w=1.0 + init(ks[4], (1, E), 0.05),
        ln2_b=init(ks[5], (1, E), 0.05),
        wq=init(ks[6], (E, qkv_dim), 0.2),
        bq=init(ks[7], (1, qkv_dim), 0.1),
        wk=init(ks[8], (E, qkv_dim), 0.2),
        bk=init(ks[9], (1, qkv_dim), 0.1),
        wv=init(ks[10], (E, qkv_dim), 0.2),
        bv=init(ks[11], (1, qkv_dim), 0.1),
        wo=init(ks[12], (qkv_dim, E), 0.3),
        bo=init(ks[13], (1, E), 0.1),
        ff_w1=init(ks[14], (E, 4 * E), 0.15),
        ff_w2=init(ks[15], (4 * E, E), 0.2),
    )

    x = jax.random.normal(ks[16], (B, L, E), jnp.float32)
    cond = jax.random.normal(ks[17], (B, cond_dim), jnp.float32)
    lengths = jnp.array([L, L - 3], dtype=jnp.int32)     # second row has 3 PAD keys

    # rotary tables for rotate-half RoPE, shape (L, head_dim // 2)
    inv_freq = 1.0 / (10000.0 ** (jnp.arange(0, head_dim, 2, dtype=jnp.float32) / head_dim))
    angles = jnp.arange(L, dtype=jnp.float32)[:, None] * inv_freq[None, :]
    sin_h, cos_h = jnp.sin(angles), jnp.cos(angles)

    out = jax.block_until_ready(
        dit_block(x, cond, lengths, sin_h, cos_h, params,
                  num_heads=num_heads, seq_tile=8, q_tile=8,
                  matmul_dtype=jnp.float32))
    assert out.shape == (B, L, E)

    ref_tanh = ref_forward(x, cond, lengths, sin_h, cos_h, params,
                           num_heads=num_heads, head_dim=head_dim, gelu="tanh")
    ref_erf = ref_forward(x, cond, lengths, sin_h, cos_h, params,
                          num_heads=num_heads, head_dim=head_dim, gelu="erf")

    err_tanh = float(jnp.max(jnp.abs(out - ref_tanh)))
    err_erf = float(jnp.max(jnp.abs(out - ref_erf)))
    # same math as the tanh-GELU reference: only fp reassociation differs
    assert err_tanh < 2e-3, f"kernel vs tanh-GELU reference: max abs err {err_tanh}"
    # deviation from the exact-erf (torch nn.GELU default) forward is bounded by the
    # tanh-GELU approximation error propagated through the final LayerNorm
    assert err_erf < 6e-3, f"kernel vs exact-GELU reference: max abs err {err_erf}"

    print("KERNEL_OK")
</pallas_src>

<mosaic_0001>
module attributes {stable_mosaic.version = 11 : i64} {
  func.func @_qkv_kernel(%arg0: i32, %arg1: i32, %arg2: memref<1x8x32xf32, #tpu.memory_space<vmem>>, %arg3: memref<1x6x32xf32, #tpu.memory_space<vmem>>, %arg4: memref<1x32xf32, #tpu.memory_space<vmem>>, %arg5: memref<1x32xf32, #tpu.memory_space<vmem>>, %arg6: memref<32x96xf32, #tpu.memory_space<vmem>>, %arg7: memref<1x96xf32, #tpu.memory_space<vmem>>, %arg8: memref<1x8x96xf32, #tpu.memory_space<vmem>>) attributes {dimension_semantics = [#tpu.dimension_semantics<parallel>, #tpu.dimension_semantics<parallel>], iteration_bounds = array<i64: 2, 2>, scalar_prefetch = 0 : i64, scratch_operands = 0 : i64, tpu.core_type = #tpu.core_type<tc>, window_params = [{transform_indices = @transform_0, window_bounds = array<i64: 1, 8, 32>}, {transform_indices = @transform_1, window_bounds = array<i64: 1, 6, 32>}, {pipeline_mode = #tpu.pipeline_mode<synchronous>, transform_indices = @transform_2, window_bounds = array<i64: 1, 32>}, {pipeline_mode = #tpu.pipeline_mode<synchronous>, transform_indices = @transform_3, window_bounds = array<i64: 1, 32>}, {pipeline_mode = #tpu.pipeline_mode<synchronous>, transform_indices = @transform_4, window_bounds = array<i64: 32, 96>}, {pipeline_mode = #tpu.pipeline_mode<synchronous>, transform_indices = @transform_5, window_bounds = array<i64: 1, 96>}, {transform_indices = @transform_6, window_bounds = array<i64: 1, 8, 96>}]} {
    %c0 = arith.constant 0 : index
    %c0_0 = arith.constant 0 : index
    %c0_1 = arith.constant 0 : index
    %0 = vector.load %arg2[%c0, %c0_0, %c0_1] : memref<1x8x32xf32, #tpu.memory_space<vmem>>, vector<1x8x32xf32>
    %1 = vector.shape_cast %0 : vector<1x8x32xf32> to vector<8x32xf32>
    %c0_2 = arith.constant 0 : index
    %c0_3 = arith.constant 0 : index
    %c0_4 = arith.constant 0 : index
    %2 = vector.load %arg3[%c0_2, %c0_3, %c0_4] : memref<1x6x32xf32, #tpu.memory_space<vmem>>, vector<1x6x32xf32>
    %3 = vector.shape_cast %2 : vector<1x6x32xf32> to vector<6x32xf32>
    %4 = vector.extract_strided_slice %3 {offsets = [1, 0], sizes = [1, 32], strides = [1, 1]} : vector<6x32xf32> to vector<1x32xf32>
    %5 = vector.extract_strided_slice %3 {offsets = [2, 0], sizes = [1, 32], strides = [1, 1]} : vector<6x32xf32> to vector<1x32xf32>
    %cst = arith.constant dense<0.000000e+00> : vector<8xf32>
    %6 = vector.multi_reduction <add>, %1, %cst [1] : vector<8x32xf32> to vector<8xf32>
    %7 = vector.shape_cast %6 : vector<8xf32> to vector<8x1xf32>
    %cst_5 = arith.constant 3.200000e+01 : f32
    %8 = vector.broadcast %cst_5 : f32 to vector<8x1xf32>
    %9 = arith.divf %7, %8 : vector<8x1xf32>
    %10 = vector.broadcast %9 : vector<8x1xf32> to vector<8x32xf32>
    %11 = arith.subf %1, %10 : vector<8x32xf32>
    %12 = arith.mulf %11, %11 : vector<8x32xf32>
    %cst_6 = arith.constant dense<0.000000e+00> : vector<8xf32>
    %13 = vector.multi_reduction <add>, %12, %cst_6 [1] : vector<8x32xf32> to vector<8xf32>
    %14 = vector.shape_cast %13 : vector<8xf32> to vector<8x1xf32>
    %cst_7 = arith.constant 3.200000e+01 : f32
    %15 = vector.broadcast %cst_7 : f32 to vector<8x1xf32>
    %16 = arith.divf %14, %15 : vector<8x1xf32>
    %17 = vector.broadcast %9 : vector<8x1xf32> to vector<8x32xf32>
    %18 = arith.subf %1, %17 : vector<8x32xf32>
    %cst_8 = arith.constant 9.99999974E-6 : f32
    %19 = vector.broadcast %cst_8 : f32 to vector<8x1xf32>
    %20 = arith.addf %16, %19 : vector<8x1xf32>
    %21 = math.rsqrt %20 : vector<8x1xf32>
    %22 = vector.broadcast %21 : vector<8x1xf32> to vector<8x32xf32>
    %23 = arith.mulf %18, %22 : vector<8x32xf32>
    %c0_9 = arith.constant 0 : index
    %c0_10 = arith.constant 0 : index
    %24 = vector.load %arg4[%c0_9, %c0_10] : memref<1x32xf32, #tpu.memory_space<vmem>>, vector<1x32xf32>
    %25 = vector.broadcast %24 : vector<1x32xf32> to vector<8x32xf32>
    %26 = arith.mulf %23, %25 : vector<8x32xf32>
    %c0_11 = arith.constant 0 : index
    %c0_12 = arith.constant 0 : index
    %27 = vector.load %arg5[%c0_11, %c0_12] : memref<1x32xf32, #tpu.memory_space<vmem>>, vector<1x32xf32>
    %28 = vector.broadcast %27 : vector<1x32xf32> to vector<8x32xf32>
    %29 = arith.addf %26, %28 : vector<8x32xf32>
    %cst_13 = arith.constant 1.000000e+00 : f32
    %30 = vector.broadcast %cst_13 : f32 to vector<1x32xf32>
    %31 = arith.addf %5, %30 : vector<1x32xf32>
    %32 = vector.broadcast %31 : vector<1x32xf32> to vector<8x32xf32>
    %33 = arith.mulf %29, %32 : vector<8x32xf32>
    %34 = vector.broadcast %4 : vector<1x32xf32> to vector<8x32xf32>
    %35 = arith.addf %33, %34 : vector<8x32xf32>
    %cst_14 = arith.constant dense<0.000000e+00> : vector<8xf32>
    %36 = vector.multi_reduction <add>, %35, %cst_14 [1] : vector<8x32xf32> to vector<8xf32>
    %37 = vector.shape_cast %36 : vector<8xf32> to vector<8x1xf32>
    %cst_15 = arith.constant 3.200000e+01 : f32
    %38 = vector.broadcast %cst_15 : f32 to vector<8x1xf32>
    %39 = arith.divf %37, %38 : vector<8x1xf32>
    %40 = vector.broadcast %39 : vector<8x1xf32> to vector<8x32xf32>
    %41 = arith.subf %35, %40 : vector<8x32xf32>
    %42 = arith.mulf %41, %41 : vector<8x32xf32>
    %cst_16 = arith.constant dense<0.000000e+00> : vector<8xf32>
    %43 = vector.multi_reduction <add>, %42, %cst_16 [1] : vector<8x32xf32> to vector<8xf32>
    %44 = vector.shape_cast %43 : vector<8xf32> to vector<8x1xf32>
    %cst_17 = arith.constant 3.200000e+01 : f32
    %45 = vector.broadcast %cst_17 : f32 to vector<8x1xf32>
    %46 = arith.divf %44, %45 : vector<8x1xf32>
    %47 = vector.broadcast %39 : vector<8x1xf32> to vector<8x32xf32>
    %48 = arith.subf %35, %47 : vector<8x32xf32>
    %cst_18 = arith.constant 9.99999974E-6 : f32
    %49 = vector.broadcast %cst_18 : f32 to vector<8x1xf32>
    %50 = arith.addf %46, %49 : vector<8x1xf32>
    %51 = math.rsqrt %50 : vector<8x1xf32>
    %52 = vector.broadcast %51 : vector<8x1xf32> to vector<8x32xf32>
    %53 = arith.mulf %48, %52 : vector<8x32xf32>
    %c0_19 = arith.constant 0 : index
    %c0_20 = arith.constant 0 : index
    %54 = vector.load %arg6[%c0_19, %c0_20] : memref<32x96xf32, #tpu.memory_space<vmem>>, vector<32x96xf32>
    %cst_21 = arith.constant dense<0.000000e+00> : vector<8x96xf32>
    %55 = tpu.matmul %53, %54, %cst_21 {dimension_numbers = #tpu.dot_dimension_numbers<[1], [0], [0], [1], [0, 0, 1, 1], [], []>} : vector<8x32xf32>, vector<32x96xf32>, vector<8x96xf32> -> vector<8x96xf32>
    %c0_22 = arith.constant 0 : index
    %c0_23 = arith.constant 0 : index
    %56 = vector.load %arg7[%c0_22, %c0_23] : memref<1x96xf32, #tpu.memory_space<vmem>>, vector<1x96xf32>
    %57 = vector.broadcast %56 : vector<1x96xf32> to vector<8x96xf32>
    %58 = arith.addf %55, %57 : vector<8x96xf32>
    %c0_24 = arith.constant 0 : index
    %c0_25 = arith.constant 0 : index
    %c0_26 = arith.constant 0 : index
    %59 = vector.load %arg8[%c0_24, %c0_25, %c0_26] : memref<1x8x96xf32, #tpu.memory_space<vmem>>, vector<1x8x96xf32>
    %60 = vector.shape_cast %59 : vector<1x8x96xf32> to vector<8x96xf32>
    %61 = vector.shape_cast %58 : vector<8x96xf32> to vector<1x8x96xf32>
    tpu.vector_store %arg8[%c0_24, %c0_25, %c0_26], %61 {strides = array<i32>} : memref<1x8x96xf32, #tpu.memory_space<vmem>>, vector<1x8x96xf32>,
    return
  }
  func.func @transform_0(%arg0: i32, %arg1: i32) -> (i32, i32, i32) {
    %c0_i32 = arith.constant 0 : i32
    %c0_i32_0 = arith.constant 0 : i32
    return %arg0, %arg1, %c0_i32 : i32, i32, i32
  }
  func.func @transform_1(%arg0: i32, %arg1: i32) -> (i32, i32, i32) {
    %c0_i32 = arith.constant 0 : i32
    %c0_i32_0 = arith.constant 0 : i32
    %c0_i32_1 = arith.constant 0 : i32
    return %arg0, %c0_i32, %c0_i32_0 : i32, i32, i32
  }
  func.func @transform_2(%arg0: i32, %arg1: i32) -> (i32, i32) {
    %c0_i32 = arith.constant 0 : i32
    %c0_i32_0 = arith.constant 0 : i32
    %c0_i32_1 = arith.constant 0 : i32
    return %c0_i32, %c0_i32_0 : i32, i32
  }
  func.func @transform_3(%arg0: i32, %arg1: i32) -> (i32, i32) {
    %c0_i32 = arith.constant 0 : i32
    %c0_i32_0 = arith.constant 0 : i32
    %c0_i32_1 = arith.constant 0 : i32
    return %c0_i32, %c0_i32_0 : i32, i32
  }
  func.func @transform_4(%arg0: i32, %arg1: i32) -> (i32, i32) {
    %c0_i32 = arith.constant 0 : i32
    %c0_i32_0 = arith.constant 0 : i32
    %c0_i32_1 = arith.constant 0 : i32
    return %c0_i32, %c0_i32_0 : i32, i32
  }
  func.func @transform_5(%arg0: i32, %arg1: i32) -> (i32, i32) {
    %c0_i32 = arith.constant 0 : i32
    %c0_i32_0 = arith.constant 0 : i32
    %c0_i32_1 = arith.constant 0 : i32
    return %c0_i32, %c0_i32_0 : i32, i32
  }
  func.func @transform_6(%arg0: i32, %arg1: i32) -> (i32, i32, i32) {
    %c0_i32 = arith.constant 0 : i32
    %c0_i32_0 = arith.constant 0 : i32
    return %arg0, %arg1, %c0_i32 : i32, i32, i32
  }
}

</mosaic_0001>

<bundles_post_ra>
// kernel: tpu_custom_call.1
= control target key start
LH: loop header
LB: loop body
LE: loop exit
PB: predicated region body
PF: predicated region fallthrough
CT: control target
= control target key end

     0   :  { %s1040_s0 = inlined_call_operand.hbm [shape: f32[2,16,32], index: 0, kind: input, shape index: {}]   ;;  %s1041_s1 = inlined_call_operand.vmem [shape: f32[2,6,32], index: 1, kind: input, shape index: {}]   ;;  %s1042_s2 = inlined_call_operand.vmem [shape: f32[1,32], index: 2, kind: input, shape index: {}]   ;;  %s1043_s3 = inlined_call_operand.vmem [shape: f32[1,32], index: 3, kind: input, shape index: {}]   ;;  %s1044_s4 = inlined_call_operand.vmem [shape: f32[32,96], index: 4, kind: input, shape index: {}]   ;;  %s1045_s5 = inlined_call_operand.vmem [shape: f32[1,96], index: 5, kind: input, shape index: {}]   ;;  %s1046_s6 = inlined_call_operand.hbm [shape: f32[2,16,96], index: 6, kind: output, shape index: {}]  }
   0x1   :  { %1051 = sst [smem:[#allocation11_spill]] %s1046_s6 }
   0x2   :  { %11 = vsyncpa [#allocation3], 0 }
   0x3   :  { %13 = vsyncpa [#allocation3 + $0x1], 0 }
   0x4   :  { %14 = vsyncpa [#allocation4], 0 }
   0x5   :  { %16 = vsyncpa [#allocation4 + $0x1], 0  ;;  %s843_s21 = smov 0   ;;  %s845_s22 = smov 0  }
   0x6   :  { %s847_s23 = smov 0   ;;  %s849_s24 = smov 0  }
   0x7   :  { %s851_s25 = smov 0   ;;  %s853_s26 = smov 0  }
   0x8   :  { %s855_s27 = smov 0   ;;  %s857_s28 = smov 0  }
   0x9 LB: > { %1052 = sst [smem:[#allocation8_spill]] %s774_s21  ;;  %s558_s29 = sadd.s32 4294967295, %s802_s28   ;;  %s802_s28 = sphi %s857_s28, %s22_s28   ;;  %s798_s27 = sphi %s855_s27, %s1072_s27   ;;  %s794_s26 = sphi %s853_s26, %s1071_s26   ;;  %s790_s25 = sphi %s851_s25, %s1070_s25   ;;  %s786_s24 = sphi %s849_s24, %s1069_s24   ;;  %s782_s23 = sphi %s847_s23, %s1068_s23   ;;  %s778_s22 = sphi %s845_s22, %s1067_s22   ;;  %s774_s21 = sphi %s843_s21, %s1066_s21  }
   0xa   : > { %s559_s30 = sadd.s32 4294967294, %s802_s28   ;;  %s31_s7 = sadd.s32 1, %s794_s26 }
   0xb   : > { %s34_s8 = sadd.s32 1, %s798_s27  ;;  %p32_p0 = scmp.ge.s32.totalorder %s31_s7, 2 }
   0xc   : > { %s43_s9 = sadd.s32 1, %s782_s23  ;;  %p50_p1 = scmp.ne.s32.totalorder %s782_s23, %s778_s22 }
   0xd   : > { %p51_p2 = scmp.eq.s32.totalorder %s802_s28, 0  ;;  %s1074_s7 = smov (%p32_p0, %s31_s7), 0 }
   0xe   : > { %1053 = sst [smem:[#allocation9_spill]] %s1074_s7  ;;  %s1076_s8 = smov (!%p32_p0, %s34_s8), %s798_s27 }
   0xf   : > { %s39_s10 = ssub.s32 %s794_s26, %s1074_s7  ;;  %p896_p3 = por %p51_p2, %p50_p1 }
  0x10   : > { %p36_p4 = scmp.ge.s32.totalorder %s1076_s8, 2  ;;  %p56_p5 = scmp.ne.s32.totalorder %s778_s22, %s774_s21 }
  0x11   : > { %p57_p6 = scmp.eq.s32.totalorder %s558_s29, 0  ;;  %p192_p7 = scmp.eq.s32.totalorder %s558_s29, 3 }
  0x12   : > { %s1078_s8 = smov (%p36_p4, %s1076_s8), 0  ;;  %p198_p10 = scmp.eq.s32.totalorder %s559_s30, 3 }
  0x13   : > { %1055 = sst [smem:[#allocation10_spill]] %s1078_s8  ;;  %p904_p8 = por %p57_p6, %p56_p5 }
  0x14   : > { %p908_p9 = por %p192_p7, %p50_p1  ;;  %s38_s14 = ssub.s32 %s798_s27, %s1078_s8 }
  0x15   : > { %s40_s15 = sor.u32 %s39_s10, %s38_s14  ;;  %p914_p12 = por %p198_p10, %p56_p5 }
  0x16   : > { %p41_p11 = scmp.eq.s32.totalorder %s40_s15, 0  ;;  %p606_p13 = scmp.lt.s32.totalorder %s802_s28, 4 }
  0x17   : > { %s1058_s16 = scalar_select %p914_p12, 1, 0 }
  0x18   : > { %s230_s17 = sand.u32 1, %s782_s23   ;;  %s563_s20 = sshll.u32 %s798_s27, 1 }
  0x19   : > { %s921_s18 = scalar_select %p41_p11, %s782_s23, %s43_s9  }
  0x1a   : > { %s562_s19 = sshll.u32 %s230_s17, 3  ;;  %s239_s29 = sadd.s32 %s794_s26, %s563_s20 }
  0x1b   : > { %s234_s7 = scalar_lea.vmem [#allocation2], %s562_s19  ;;  %s564_s8 = sshll.u32 %s239_s29, 7 }
  0x1c   : > { %s243_s21 = sshll.u32 %s234_s7, 4  ;;  %s241_s10 = scalar_lea.hbm %s1040_s0, %s564_s8  ;;  %s244_s21 = int_to_ptr.vmem [resolvable:$true] %s243_s21 }
  0x1d   : > { %p930_p0 = pnand %p606_p13, %p896_p3  ;;  %p565_p1 = scmp.ge.s32.totalorder %s802_s28, 1 }
  0x1e   : > { %p255_p2 = scmp.lt.s32.totalorder %s802_s28, 5  ;;  %s231_s9 = scalar_lea.sflag [#allocation3], %s230_s17 }
  0x1f   : > { %p680_p4 = pneg %p930_p0  ;;  %s691_s15 = scalar_lea.vmem %s244_s21, 128 }
  0x20   : > { %p692_p5 = scmp.ne.s32.totalorder %s244_s21, %s691_s15  ;;  %s804_s7 = smov [#allocation2]  }
  0x21   : > { %s696_s19 = sshll.u32 %s804_s7, 4  ;;  %s697_s19 = int_to_ptr.vmem [resolvable:$false] %s696_s19 }
  0x22   : > { %p694_p6 = pnand %p692_p5, %p680_p4  ;;  %s698_s6 = scalar_lea.vmem %s697_s19, 256 }
  0x23   : > { %p699_p10 = scmp.lt.s32.totalorder %s244_s21, %s697_s19  ;;  %p700_p11 = scmp.lt.s32.totalorder %s698_s6, %s691_s15 }
  0x24   : > { %p695_p7 = pneg %p694_p6 }
  0x25   : > { %p701_p3 = por %p700_p11, %p699_p10 }
  0x27   : > { %p702_p13 = pnand %p701_p3, %p695_p7 }
  0x29   : > { %705 = shalt.err (!%p702_p13)
}
  0x2a   : > { %601 = dma.hbm_to_vmem [thread:$0]  (!%p930_p0), %s241_s10, 128, %s244_s21, %s231_s9  }
  0x2b   : > { %p256_p12 = pnand %p565_p1, %p255_p2 }
  0x2c   : > { %s945_s8 = sand.u32 (!%p256_p12), 1, %s778_s22  }
  0x2d   : > { %259 = sbr.rel (%p256_p12) target bundleno = 876 (0x36c), region = 44  ;;  %s566_s11 = sshll.u32 (!%p256_p12), %s945_s8, 3 }
  0x2e   : > { %s262_s17 = scalar_lea.sflag (!%p256_p12), [#allocation3], %s945_s8  ;;  %s265_s20 = scalar_lea.vmem (!%p256_p12), [#allocation2], %s566_s11 }
  0x32   : > { %765 = dma.done.wait (%p904_p8), %s262_s17, 128  }
  0x33   : > { %767 = vsyncadd (%p904_p8), %s262_s17, 4294967168  ;;  %vm304_vm0 = vcmask 261120   ;;  %v302_v0 = vld [vmem:[%s265_s20] sm:$0xff]  ;;  %p298_p12 = scmp.lt.s32.totalorder %s790_s25, 1  ;;  %v336_v10 = vlaneseq  ;;  %v362_v32 = vld [vmem:[%s1044_s4 + $0x18] sm:$0xff]  ;;  %v805_v33 = vmov 0.0  }
  0x34   : > { %v305_v1 = vsel %vm304_vm0, %v302_v0, 0.0  ;;  %v569_v16 = vld [vmem:[%s1042_s2] ss:$0 sm:$0xff]  ;;  %583 = vmatprep.subr.mxu0 %v805_v33  ;;  %v361_v34 = vld [vmem:[%s1044_s4 + $0x10] sm:$0xff]  ;;  %vm806_vm1 = vmmov 0   ;;  %v360_v35 = vld [vmem:[%s1044_s4 + $0x8] sm:$0xff] }
  0x35   : > { %306 = vadd.xlane.f32.xlu0 %v305_v1  ;;  %s299_s21 = scalar_select %p298_p12, %s790_s25, 1  ;;  %v337_v11 = vshrl.u32 %v336_v10, 7  ;;  %v570_v19 = vld [vmem:[%s1043_s3] ss:$0 sm:$0xff]  ;;  %591 = vmatprep.mubr.msk.f32.mxu0 %vm806_vm1, %v805_v33  ;;  %vm443_vm2 = vcmask 785408  }
  0x36   : > { %584 = vmatpush3.msra.mxu0 %v362_v32  ;;  %v359_v36 = vld [vmem:[%s1044_s4] sm:$0xff]  ;;  %s297_s19 = scalar_lea.vmem [#allocation5], %s566_s11  ;;  %s807_s30 = smov [#allocation5]  }
  0x37   : > { %s568_s12 = sshll.u32 %s299_s21, 3  ;;  %v338_v14 = vsub.s32 2, %v337_v11  ;;  %v343_v18 = vsub.s32 1, %v337_v11  ;;  %585 = vmatprep.subr.mxu0 %v805_v33  ;;  %v571_v42 = vld [vmem:[%s1045_s5] ss:$0 sm:$0xff]  ;;  %s461_s6 = sshll.u32 %s297_s19, 4  ;;  %s462_s6 = int_to_ptr.vmem [resolvable:$true] %s461_s6 }
  0x38   : > { %s301_s10 = scalar_lea.vmem %s1041_s1, %s568_s12  ;;  %586 = vmatpush3.msra.mxu0 %v361_v34  ;;  %s1060_s21 = sld [smem:[#allocation11_spill]] }
  0x39   : > { %v303_v12 = vld [vmem:[%s301_s10] sm:$0x3f]  ;;  %587 = vmatprep.subr.mxu0 %v805_v33  ;;  %s574_s10 = sshll.u32 %s790_s25, 1  ;;  %s706_s25 = scalar_lea.vmem %s462_s6, 128 }
  0x3a   : > { %v335_v13 = vadd.f32 1.0, %v303_v12  ;;  %v344_v23 = vrot.slane %v303_v12, %v343_v18  ;;  %588 = vmatpush3.msra.mxu0 %v360_v35  ;;  %s457_s14 = sadd.s32 %s786_s24, %s574_s10  ;;  %s446_s24 = scalar_lea.sflag [#allocation4], %s945_s8 }
  0x3b   : > { %589 = vmatprep.subr.mxu0 %v805_v33  ;;  %s575_s7 = sshll.u32 %s457_s14, 7  ;;  %p707_p8 = scmp.ne.s32.totalorder %s462_s6, %s706_s25 }
  0x3c   : > { %v339_v21 = vrot.slane %v335_v13, %v338_v14  ;;  %590 = vmatpush3.msra.mxu0 %v359_v36  ;;  %s710_s11 = sshll.u32 %s807_s30, 4  ;;  %s711_s11 = int_to_ptr.vmem [resolvable:$false] %s710_s11 }
  0x3d   : > { %p708_p0 = pnand %p707_p8, %p908_p9  ;;  %s712_s10 = scalar_lea.vmem %s711_s11, 256 }
  0x3e   : > { %s1061_s12 = smov %s1060_s21  ;;  %s993_s29 = scalar_lea.hbm %s1060_s21, %s575_s7 }
  0x3f   : > { %p709_p1 = pneg %p708_p0  ;;  %p713_p2 = scmp.lt.s32.totalorder %s462_s6, %s711_s11 }
  0x40   : > { %p714_p4 = scmp.lt.s32.totalorder %s712_s10, %s706_s25 }
  0x42   : > { %p715_p5 = por %p714_p4, %p713_p2 }
  0x44   : > { %p716_p6 = pnand %p715_p5, %p709_p1 }
  0xbe   : > { %v307_v2 = vpop.xlane.xlu0 %306 }
  0xbf   : > { %v309_v3 = vmul.f32 0.03125, %v307_v2 }
  0xc1   : > { %v310_v4 = vsub.f32 %v302_v0, %v309_v3 }
  0xc3   : > { %v311_v5 = vmul.f32 %v310_v4, %v310_v4 }
  0xc5   : > { %v312_v6 = vsel %vm304_vm0, %v311_v5, 0.0 }
  0xc6   : > { %313 = vadd.xlane.f32.xlu0 %v312_v6 }
 0x14f   : > { %v314_v7 = vpop.xlane.xlu0 %313 }
 0x150   : > { %v315_v8 = vmul.f32 0.03125, %v314_v7 }
 0x152   : > { %v316_v9 = vadd.f32 1e-05, %v315_v8 }
 0x154   : > { %674 = vrsqrt.f32 %v316_v9 }
 0x161   : > { %v675_v15 = vpop.eup %674 }
 0x162   : > { %v318_v17 = vmul.f32 %v675_v15, %v310_v4 }
 0x164   : > { %v326_v20 = vmul.f32 %v569_v16, %v318_v17 }
 0x166   : > { %v334_v22 = vadd.f32 %v570_v19, %v326_v20 }
 0x168   : > { %v340_v24 = vmul.f32 %v339_v21, %v334_v22 }
 0x16a   : > { %v345_v25 = vadd.f32 %v344_v23, %v340_v24 }
 0x16c   : > { %v346_v26 = vsel %vm304_vm0, %v345_v25, 0.0 }
 0x16d   : > { %347 = vadd.xlane.f32.xlu1 %v346_v26 }
 0x1f6   : > { %v348_v27 = vpop.xlane.xlu1 %347 }
 0x1f7   : > { %v349_v28 = vmul.f32 0.03125, %v348_v27 }
 0x1f9   : > { %v350_v29 = vsub.f32 %v345_v25, %v349_v28 }
 0x1fb   : > { %v351_v30 = vmul.f32 %v350_v29, %v350_v29 }
 0x1fd   : > { %v352_v31 = vsel %vm304_vm0, %v351_v30, 0.0 }
 0x1fe   : > { %353 = vadd.xlane.f32.xlu1 %v352_v31 }
 0x287   : > { %v354_v37 = vpop.xlane.xlu1 %353 }
 0x288   : > { %v355_v38 = vmul.f32 0.03125, %v354_v37 }
 0x28a   : > { %v356_v39 = vadd.f32 1e-05, %v355_v38 }
 0x28c   : > { %676 = vrsqrt.f32 %v356_v39 }
 0x299   : > { %v677_v40 = vpop.eup %676 }
 0x29a   : > { %v358_v41 = vmul.f32 %v677_v40, %v350_v29 }
 0x29c   : > { %592 = vmatmul.mubr.msk.f32.vlgmr.msra.gmra.mxu0 %vm304_vm0, %v358_v41 }
 0x35c   : > { %v439_v43 = vpop.f32.mrf.mxu0 }
 0x35d   : > { %v440_v44 = vadd.f32 %v571_v42, %v439_v43 }
 0x35e   : > { %v593_v45 = vpop.f32.mrf.mxu0 }
 0x35f   : > { %444 = vst.msk [vmem:[%s297_s19] sm:$0xff] %vm443_vm2, %v440_v44 }
 0x360   : > { %719 = shalt.err (!%p716_p6)
}
 0x361   : > { %s720_s14 = scalar_lea.hbm %s993_s29, 128  ;;  %s724_s15 = scalar_lea.hbm %s1061_s12, 512 }
 0x362   : > { %p721_p7 = scmp.ne.s32.totalorder %s993_s29, %s720_s14  ;;  %p725_p3 = scmp.lt.s32.totalorder %s993_s29, %s1061_s12 }
 0x363   : > { %p726_p13 = scmp.lt.s32.totalorder %s724_s15, %s720_s14 }
 0x364   : > { %p722_p10 = pnand %p721_p7, %p908_p9 }
 0x365   : > { %p727_p12 = por %p726_p13, %p725_p3 }
 0x366   : > { %p723_p11 = pneg %p722_p10 }
 0x368   : > { %p728_p8 = pnand %p727_p12, %p723_p11 }
 0x36a   : > { %731 = shalt.err (!%p728_p8)
}
 0x36b   : > { %596 = dma.vmem_to_hbm [thread:$0]  (%p908_p9), %s462_s6, 128, %s993_s29, %s446_s24  }
 0x36c PF: > { %s1062_s17 = sld [smem:[#allocation8_spill]]  ;;  %p607_p0 = scmp.ge.s32.totalorder %s802_s28, 2 }
 0x36d   : > { %p1063_p1 = scmp.ne.s32.totalorder %s1058_s16, 0 }
 0x36f   : > { %p603_p2 = pnand %p607_p0, %p1063_p1 }
 0x371   : > { %p604_p4 = pneg %p603_p2 }
 0x372   : > { %s473_s20 = sand.u32 1, %s1062_s17  }
 0x373   : > { %s474_s21 = scalar_lea.sflag [#allocation4], %s473_s20 }
 0x374   : > { %769 = dma.done.wait (%p604_p4), %s474_s21, 128  }
 0x375   : > { %771 = vsyncadd (%p604_p4), %s474_s21, 4294967168  ;;  %s22_s28 = sadd.s32 1, %s802_s28   ;;  %s1064_s13 = sld [smem:[#allocation9_spill]] }
 0x376   : > { %p19_p5 = scmp.ge.s32.totalorder %s22_s28, 6   ;;  %s1065_s6 = sld [smem:[#allocation10_spill]] }
 0x377   : > { %s1066_s21 = smov %s778_s22  ;;  %s1067_s22 = smov %s782_s23 }
 0x378   : > { %s1068_s23 = smov %s921_s18  ;;  %s1069_s24 = smov %s794_s26 }
 0x379   : > { %s1070_s25 = smov %s798_s27  ;;  %21 = sbr.rel (!%p19_p5) target bundleno = 9 (0x9), region = 92 }
 0x37b   : > { %s1071_s26 = smov %s1064_s13 }
 0x37c   : > { %s1072_s27 = smov %s1065_s6 }
 0x37e   :  { %479 = vsyncpa [#allocation3], 1 }
 0x37f   :  { %481 = vsyncpa [#allocation3 + $0x1], 1 }
 0x380   :  { %482 = vsyncpa [#allocation4], 1 }
 0x381   :  { %484 = vsyncpa [#allocation4 + $0x1], 1 }

</bundles_post_ra>
